<compile_context>
chip_gen: v6e
topology: v6e:2x2x1
jax: 0.10.0
libtpu: 0.0.40
codegen_flags: <defaults>
</compile_context>

<pallas_src>
import jax
import jax.numpy as jnp
from jax.experimental import pallas as pl
from jax.experimental.pallas import tpu as pltpu

_LANES = 128
_TARGET_TILE_BYTES = 2 * 1024 * 1024  # ~2 MiB per input tile per grid step


def _round_up(x, m):
    return ((x + m - 1) // m) * m


def _default_num_shards():
    """2 only on v7x-class chips (2 TensorCores/chip); 1 elsewhere (on v5e/v6e a
    second shard is just a serial loop with extra overhead)."""
    try:
        kind = jax.devices()[0].device_kind.lower()
    except Exception:
        return 1
    return 2 if "v7" in kind else 1


def rmse_loss(pred, target, *, block_rows=None, num_shards=None):
    assert pred.shape == target.shape, "pred/target must have identical shapes"
    n = pred.size  # static Python int (static shapes)
    assert n > 0

    itemsize = max(jnp.dtype(pred.dtype).itemsize, jnp.dtype(target.dtype).itemsize)

    rows = pl.cdiv(n, _LANES)  # rows of the (rows, 128) 2-D view
    rem = n % _LANES           # ragged sub-128 tail

    # Size tiles in bytes so lower-precision inputs stream larger row counts.
    if block_rows is None:
        block_rows = _TARGET_TILE_BYTES // (_LANES * itemsize)
    block_rows = _round_up(max(8, min(block_rows, _round_up(rows, 8))), 8)

    blocks = pl.cdiv(rows, block_rows)
    if num_shards is None:
        num_shards = _default_num_shards()
    num_shards = max(1, min(num_shards, blocks))
    blocks_per_shard = pl.cdiv(blocks, num_shards)

    # Masking is needed when the last block is partial, or when sharding creates
    # fully-out-of-range grid steps; both are handled in-kernel (no host pad).
    needs_mask = (rows % block_rows != 0) or (blocks % num_shards != 0)

    def _prep(x):
        flat = jnp.ravel(x)  # free for contiguous inputs
        if rem:
            # Ragged tail only: pad < 128 elements to the next 128-multiple.
            # Zero padding in BOTH operands -> zero contribution to the sum.
            flat = jnp.pad(flat, (0, _LANES - rem))
        return flat.reshape(rows, _LANES)  # native dtype; f32 cast is in-kernel

    p2d = _prep(pred)
    t2d = _prep(target)

    groups = block_rows // 8
    last_block = blocks - 1

    def kernel(p_ref, t_ref, out_ref, acc_ref):
        r = pl.program_id(1)

        @pl.when(r == 0)
        def _():
            acc_ref[...] = jnp.zeros_like(acc_ref)

        d = p_ref[...].astype(jnp.float32) - t_ref[...].astype(jnp.float32)
        sq = d * d

        def _accum(v):
            # Reduce only along the grouped leading axis: (groups,8,128) -> (8,128).
            acc_ref[...] += jnp.sum(v.reshape(groups, 8, _LANES), axis=0)

        if needs_mask:
            blk = pl.program_id(0) * blocks_per_shard + r

            @pl.when(blk < last_block)
            def _():
                _accum(sq)

            @pl.when(blk >= last_block)
            def _():
                # Partial (or fully out-of-range) block: keep only valid rows;
                # jnp.where (select) also blocks NaN/garbage from OOB rows.
                row = blk * block_rows + jax.lax.broadcasted_iota(
                    jnp.int32, (block_rows, _LANES), 0)
                _accum(jnp.where(row < rows, sq, 0.0))
        else:
            _accum(sq)

        # Write each shard's (8,128) partial exactly once.
        @pl.when(r == pl.num_programs(1) - 1)
        def _():
            out_ref[...] = acc_ref[...]

    if blocks % num_shards:
        # Clamp so fully out-of-range grid steps re-read a valid block (their
        # contribution is masked to zero inside the kernel).
        in_map = lambda s, r: (jnp.minimum(s * blocks_per_shard + r, last_block), 0)
    else:
        in_map = lambda s, r: (s * blocks_per_shard + r, 0)

    if num_shards > 1 and hasattr(pltpu, "CORE_PARALLEL"):
        dims = (pltpu.CORE_PARALLEL, pltpu.ARBITRARY)  # v7x: both TCs stream HBM
    elif num_shards > 1:
        dims = ("parallel", "arbitrary")
    else:
        dims = ("arbitrary", "arbitrary")

    partials = pl.pallas_call(
        kernel,
        out_shape=jax.ShapeDtypeStruct((num_shards * 8, _LANES), jnp.float32),
        grid_spec=pltpu.PrefetchScalarGridSpec(
            num_scalar_prefetch=0,
            grid=(num_shards, blocks_per_shard),
            in_specs=[
                pl.BlockSpec((block_rows, _LANES), in_map),
                pl.BlockSpec((block_rows, _LANES), in_map),
            ],
            out_specs=pl.BlockSpec((8, _LANES), lambda s, r: (s, 0)),
            scratch_shapes=[pltpu.VMEM((8, _LANES), jnp.float32)],
        ),
        compiler_params=pltpu.CompilerParams(dimension_semantics=dims),
        cost_estimate=pl.CostEstimate(
            flops=3 * n,
            transcendentals=0,
            bytes_accessed=2 * n * itemsize + num_shards * 8 * _LANES * 4,
        ),
    )(p2d, t2d)

    # Tiny epilogue: cross-lane / cross-shard reduce, mean over ORIGINAL n, sqrt.
    return jnp.sqrt(jnp.sum(partials) / n)


if __name__ == "__main__":
    key = jax.random.PRNGKey(0)
    k1, k2, k3, k4, k5, k6, k7, k8 = jax.random.split(key, 8)

    # Main test: typical NCHW regression output shape (128-divisible -> no copy).
    pred = jax.random.normal(k1, (2, 4, 16, 16), dtype=jnp.float32)
    target = jax.random.normal(k2, (2, 4, 16, 16), dtype=jnp.float32)
    loss = jax.block_until_ready(rmse_loss(pred, target))
    ref = jnp.sqrt(jnp.mean((pred - target) ** 2))
    assert jnp.allclose(loss, ref, rtol=1e-5, atol=1e-6), (loss, ref)

    # Ragged size (n % 128 != 0 -> tiny tail pad + in-kernel row mask).
    p2 = jax.random.normal(k3, (3, 5, 7), dtype=jnp.float32)
    t2 = jax.random.normal(k4, (3, 5, 7), dtype=jnp.float32)
    loss2 = jax.block_until_ready(rmse_loss(p2, t2))
    ref2 = jnp.sqrt(jnp.mean((p2 - t2) ** 2))
    assert jnp.allclose(loss2, ref2, rtol=1e-5, atol=1e-6), (loss2, ref2)

    # Multi-block with a partial last block (rows % block_rows != 0), no host pad.
    p3 = jax.random.normal(k5, (16, 257, 128), dtype=jnp.float32)
    t3 = jax.random.normal(k6, (16, 257, 128), dtype=jnp.float32)
    loss3 = jax.block_until_ready(rmse_loss(p3, t3))
    ref3 = jnp.sqrt(jnp.mean((p3 - t3) ** 2))
    assert jnp.allclose(loss3, ref3, rtol=1e-5, atol=1e-6), (loss3, ref3)

    # bf16 inputs: exercises bytes-based tile sizing + in-kernel f32 cast.
    p4 = jax.random.normal(k7, (4, 128, 128), dtype=jnp.bfloat16)
    t4 = jax.random.normal(k8, (4, 128, 128), dtype=jnp.bfloat16)
    loss4 = jax.block_until_ready(rmse_loss(p4, t4))
    d4 = p4.astype(jnp.float32) - t4.astype(jnp.float32)
    ref4 = jnp.sqrt(jnp.mean(d4 * d4))
    assert jnp.allclose(loss4, ref4, rtol=1e-4, atol=1e-5), (loss4, ref4)

    print("KERNEL_OK")
</pallas_src>

<mosaic_0001>
module attributes {stable_mosaic.version = 11 : i64} {
  func.func @kernel(%arg0: i32, %arg1: i32, %arg2: memref<16x128xf32, #tpu.memory_space<vmem>>, %arg3: memref<16x128xf32, #tpu.memory_space<vmem>>, %arg4: memref<8x128xf32, #tpu.memory_space<vmem>>, %arg5: memref<8x128xf32, #tpu.memory_space<vmem>>) attributes {dimension_semantics = [#tpu.dimension_semantics<arbitrary>, #tpu.dimension_semantics<arbitrary>], iteration_bounds = array<i64: 1, 1>, scalar_prefetch = 0 : i64, scratch_operands = 1 : i64, tpu.core_type = #tpu.core_type<tc>, window_params = [{transform_indices = @transform_0, window_bounds = array<i64: 16, 128>}, {transform_indices = @transform_1, window_bounds = array<i64: 16, 128>}, {transform_indices = @transform_2, window_bounds = array<i64: 8, 128>}]} {
    %c0_i32 = arith.constant 0 : i32
    %0 = arith.cmpi eq, %arg1, %c0_i32 : i32
    %1 = arith.extui %0 : i1 to i32
    %c0_i32_0 = arith.constant 0 : i32
    %2 = arith.cmpi ne, %1, %c0_i32_0 : i32
    scf.if %2 {
      %cst_10 = arith.constant 0.000000e+00 : f32
      %15 = vector.broadcast %cst_10 : f32 to vector<8x128xf32>
      %c0_11 = arith.constant 0 : index
      %c0_12 = arith.constant 0 : index
      %16 = vector.load %arg5[%c0_11, %c0_12] : memref<8x128xf32, #tpu.memory_space<vmem>>, vector<8x128xf32>
      tpu.vector_store %arg5[%c0_11, %c0_12], %15 {strides = array<i32>} : memref<8x128xf32, #tpu.memory_space<vmem>>, vector<8x128xf32>,
    } else {
    }
    %c0 = arith.constant 0 : index
    %c0_1 = arith.constant 0 : index
    %3 = vector.load %arg2[%c0, %c0_1] : memref<16x128xf32, #tpu.memory_space<vmem>>, vector<16x128xf32>
    %c0_2 = arith.constant 0 : index
    %c0_3 = arith.constant 0 : index
    %4 = vector.load %arg3[%c0_2, %c0_3] : memref<16x128xf32, #tpu.memory_space<vmem>>, vector<16x128xf32>
    %5 = arith.subf %3, %4 : vector<16x128xf32>
    %6 = arith.mulf %5, %5 : vector<16x128xf32>
    %c0_4 = arith.constant 0 : index
    %c0_5 = arith.constant 0 : index
    %7 = vector.load %arg5[%c0_4, %c0_5] : memref<8x128xf32, #tpu.memory_space<vmem>>, vector<8x128xf32>
    %8 = vector.shape_cast %6 : vector<16x128xf32> to vector<2x8x128xf32>
    %cst = arith.constant dense<0.000000e+00> : vector<8x128xf32>
    %9 = vector.multi_reduction <add>, %8, %cst [0] : vector<2x8x128xf32> to vector<8x128xf32>
    %10 = arith.addf %7, %9 : vector<8x128xf32>
    %c0_6 = arith.constant 0 : index
    %c0_7 = arith.constant 0 : index
    %11 = vector.load %arg5[%c0_6, %c0_7] : memref<8x128xf32, #tpu.memory_space<vmem>>, vector<8x128xf32>
    tpu.vector_store %arg5[%c0_6, %c0_7], %10 {strides = array<i32>} : memref<8x128xf32, #tpu.memory_space<vmem>>, vector<8x128xf32>,
    %c0_i32_8 = arith.constant 0 : i32
    %12 = arith.cmpi eq, %arg1, %c0_i32_8 : i32
    %13 = arith.extui %12 : i1 to i32
    %c0_i32_9 = arith.constant 0 : i32
    %14 = arith.cmpi ne, %13, %c0_i32_9 : i32
    scf.if %14 {
      %c0_10 = arith.constant 0 : index
      %c0_11 = arith.constant 0 : index
      %15 = vector.load %arg5[%c0_10, %c0_11] : memref<8x128xf32, #tpu.memory_space<vmem>>, vector<8x128xf32>
      %c0_12 = arith.constant 0 : index
      %c0_13 = arith.constant 0 : index
      %16 = vector.load %arg4[%c0_12, %c0_13] : memref<8x128xf32, #tpu.memory_space<vmem>>, vector<8x128xf32>
      tpu.vector_store %arg4[%c0_12, %c0_13], %15 {strides = array<i32>} : memref<8x128xf32, #tpu.memory_space<vmem>>, vector<8x128xf32>,
    } else {
    }
    return
  }
  func.func @transform_0(%arg0: i32, %arg1: i32) -> (i32, i32) {
    %c1_i32 = arith.constant 1 : i32
    %0 = arith.muli %arg0, %c1_i32 : i32
    %1 = arith.addi %0, %arg1 : i32
    %c0_i32 = arith.constant 0 : i32
    %c0_i32_0 = arith.constant 0 : i32
    return %1, %c0_i32 : i32, i32
  }
  func.func @transform_1(%arg0: i32, %arg1: i32) -> (i32, i32) {
    %c1_i32 = arith.constant 1 : i32
    %0 = arith.muli %arg0, %c1_i32 : i32
    %1 = arith.addi %0, %arg1 : i32
    %c0_i32 = arith.constant 0 : i32
    %c0_i32_0 = arith.constant 0 : i32
    return %1, %c0_i32 : i32, i32
  }
  func.func @transform_2(%arg0: i32, %arg1: i32) -> (i32, i32) {
    %c0_i32 = arith.constant 0 : i32
    %c0_i32_0 = arith.constant 0 : i32
    return %arg0, %c0_i32 : i32, i32
  }
}

</mosaic_0001>

<bundles_post_ra>
// kernel: tpu_custom_call.1
= control target key start
LH: loop header
LB: loop body
LE: loop exit
PB: predicated region body
PF: predicated region fallthrough
CT: control target
= control target key end

     0   :  { %7 = vsyncpa [#allocation4], 0  ;;  %s190_s0 = inlined_call_operand.hbm [shape: f32[16,128], index: 0, kind: input, shape index: {}]   ;;  %s191_s1 = inlined_call_operand.hbm [shape: f32[16,128], index: 1, kind: input, shape index: {}]   ;;  %s192_s2 = inlined_call_operand.hbm [shape: f32[8,128], index: 2, kind: output, shape index: {}]  }
   0x1   :  { %8 = vsyncpa [#allocation7], 0 }
   0x2   :  { %9 = vsyncpa [#allocation5], 0  ;;  %s161_s9 = smov [#allocation3]  }
   0x3   :  { %s19_s10 = sshll.u32 %s161_s9, 4  ;;  %s20_s10 = int_to_ptr.vmem [resolvable:$true] %s19_s10 }
   0x4   :  { %s103_s11 = scalar_lea.vmem %s20_s10, 256  ;;  %p108_p1 = scmp.lt.s32.totalorder %s20_s10, %s20_s10 }
   0x5   :  { %p104_p0 = scmp.ne.s32.totalorder %s20_s10, %s103_s11  ;;  %p109_p2 = scmp.lt.s32.totalorder %s103_s11, %s103_s11 }
   0x7   :  { %p110_p3 = por %p109_p2, %p108_p1 }
   0x9   :  { %p111_p4 = pnand %p110_p3, %p104_p0 }
   0xb   :  { %114 = shalt.err (!%p111_p4)
}
   0xc   :  { %s162_s12 = smov 128   ;;  %s163_s13 = smov 8  }
   0xd   :  { %25 = dma.hbm_to_vmem [thread:$0]  %s190_s0, 256, %s20_s10, [#allocation4], %s162_s12, %s162_s12, %s163_s13  }
   0xe   :  { %s164_s16 = smov [#allocation6]  }
   0xf   :  { %s35_s17 = sshll.u32 %s164_s16, 4  ;;  %s36_s17 = int_to_ptr.vmem [resolvable:$true] %s35_s17 }
  0x10   :  { %s123_s18 = scalar_lea.vmem %s36_s17, 256  ;;  %p128_p6 = scmp.lt.s32.totalorder %s36_s17, %s36_s17 }
  0x11   :  { %p124_p5 = scmp.ne.s32.totalorder %s36_s17, %s123_s18  ;;  %p129_p7 = scmp.lt.s32.totalorder %s123_s18, %s123_s18 }
  0x13   :  { %p130_p8 = por %p129_p7, %p128_p6 }
  0x15   :  { %p131_p9 = pnand %p130_p8, %p124_p5 }
  0x17   :  { %134 = shalt.err (!%p131_p9)
}
  0x18   :  { %41 = dma.hbm_to_vmem [thread:$0]  %s191_s1, 256, %s36_s17, [#allocation7], %s162_s12, %s162_s12, %s163_s13  }
  0x19   :  { %155 = dma.done.wait [#allocation4], 256  }
  0x1a   :  { %156 = vsyncadd [#allocation4], 4294967040 }
  0x1b   :  { %157 = dma.done.wait [#allocation7], 256  }
  0x1c   :  { %158 = vsyncadd [#allocation7], 4294967040  ;;  %v57_v0 = vld [vmem:[#allocation3] sm:$0xff]  ;;  %v58_v1 = vld [vmem:[#allocation3 + $0x8] sm:$0xff]  ;;  %s165_s0 = smov [#allocation8]  }
  0x1d   :  { %v59_v2 = vld [vmem:[#allocation6] sm:$0xff]  ;;  %v60_v3 = vld [vmem:[#allocation6 + $0x8] sm:$0xff]  ;;  %s80_s21 = sshll.u32 %s165_s0, 4  ;;  %s81_s21 = int_to_ptr.vmem [resolvable:$true] %s80_s21 }
  0x1e   :  { %v61_v4 = vsub.f32 %v57_v0, %v59_v2  ;;  %v62_v5 = vsub.f32 %v58_v1, %v60_v3  ;;  %s135_s22 = scalar_lea.vmem %s81_s21, 128  ;;  %p140_p11 = scmp.lt.s32.totalorder %s81_s21, %s81_s21 }
  0x1f   :  { %p136_p10 = scmp.ne.s32.totalorder %s81_s21, %s135_s22  ;;  %p141_p12 = scmp.lt.s32.totalorder %s135_s22, %s135_s22 }
  0x20   :  { %v63_v6 = vmul.f32 %v61_v4, %v61_v4  ;;  %v64_v7 = vmul.f32 %v62_v5, %v62_v5 }
  0x21   :  { %p142_p13 = por %p141_p12, %p140_p11 }
  0x22   :  { %v66_v8 = vadd.f32 %v64_v7, %v63_v6 }
  0x23   :  { %p143_p0 = pnand %p142_p13, %p136_p10 }
  0x24   :  { %73 = vst [vmem:[#allocation8] sm:$0xff] %v66_v8 }
  0x25   :  { %146 = shalt.err (!%p143_p0)
}
  0x26   :  { %83 = dma.vmem_to_hbm [thread:$0]  %s81_s21, 128, %s192_s2, [#allocation5]  }
  0x27   :  { %159 = dma.done.wait [#allocation5], 128  }
  0x28   :  { %160 = vsyncadd [#allocation5], 4294967168 }
  0x29   :  { %87 = vsyncpa [#allocation4], 1 }
  0x2a   :  { %88 = vsyncpa [#allocation7], 1 }
  0x2b   :  { %89 = vsyncpa [#allocation5], 1 }

</bundles_post_ra>
